<compile_context>
chip_gen: v7x
topology: tpu7x:2x2x1
jax: 0.10.0
libtpu: 0.0.40
codegen_flags: <defaults>
</compile_context>

<pallas_src>
import functools

import jax
import jax.numpy as jnp
from jax import lax
from jax.experimental import pallas as pl
from jax.experimental.pallas import tpu as pltpu


def _round_up(a, b):
    return (a + b - 1) // b * b


def _cosface_kernel(x_ref, wt_ref, y_ref, out_ref,
                    xn_scr, m_scr, l_scr, t_scr,
                    *, s, m, num_classes, c_tile, mxu_dtype, exp_in_bf16):
    c = pl.program_id(1)
    n_c = pl.num_programs(1)
    b_tile = x_ref.shape[0]
    n_grp = c_tile // 128

    @pl.when(c == 0)
    def _init():
        # Normalize the resident x block once per batch tile (rsqrt -> EUP slot),
        # fold the CosFace scale s into it (power-of-two -> exact in bf16), and
        # cache it in MXU dtype for every C tile of this batch tile.
        x = x_ref[...].astype(jnp.float32)
        x_inv = lax.rsqrt(jnp.maximum(
            jnp.sum(x * x, axis=-1, keepdims=True), jnp.float32(1e-24)))
        xn_scr[...] = (x * (x_inv * s)).astype(mxu_dtype)
        m_scr[...] = jnp.full(m_scr.shape, -jnp.inf, jnp.float32)
        l_scr[...] = jnp.zeros(l_scr.shape, jnp.float32)
        t_scr[...] = jnp.zeros(t_scr.shape, jnp.float32)

    # logits tile (already scaled by s):
    #   (b_tile, c_tile) = (b_tile, D_pad) @ (D_pad, c_tile), bf16 MXU inputs,
    #   f32 accumulation.  w arrives pre-normalized, pre-transposed, bf16 ->
    #   nothing but the matmul runs on the streamed operand.
    logits = jnp.dot(xn_scr[...], wt_ref[...],
                     preferred_element_type=jnp.float32)

    y = y_ref[...]                                             # (b_tile, 1) int32
    lane = lax.broadcasted_iota(jnp.int32, (b_tile, 128), 1)
    base = c * c_tile

    # Per-lane (VPU-only) tile processing: split the c_tile lanes into 128-wide
    # lane-aligned groups (static slices select vreg columns, no data movement),
    # apply the additive margin / padding mask per group, and maintain
    # (b_tile, 128) per-lane running max / sum / target accumulators.  No
    # cross-lane XLU reduction happens per tile.
    grp = []
    t_acc = jnp.zeros((b_tile, 128), jnp.float32)
    for g in range(n_grp):
        lg = logits[:, g * 128:(g + 1) * 128]
        col = base + g * 128 + lane
        is_tgt = col == y
        lg = jnp.where(is_tgt, lg - s * m, lg)                 # additive margin
        if num_classes % c_tile != 0:
            # mask padded class columns so they do not corrupt the logsumexp
            lg = jnp.where(col < num_classes, lg, jnp.float32(-1e30))
        t_acc = t_acc + jnp.where(is_tgt, lg, 0.0)
        grp.append(lg)
    t_scr[...] += t_acc

    m_tile = grp[0]
    for g in range(1, n_grp):
        m_tile = jnp.maximum(m_tile, grp[g])

    m_prev = m_scr[...]
    m_new = jnp.maximum(m_prev, m_tile)

    p_sum = jnp.zeros((b_tile, 128), jnp.float32)
    for g in range(n_grp):
        z = grp[g] - m_new
        if exp_in_bf16:
            # v6e/v7x only: EUP bf16 path (~2x).  Do NOT enable on v5e.
            p_sum = p_sum + jnp.exp(z.astype(jnp.bfloat16)).astype(jnp.float32)
        else:
            p_sum = p_sum + jnp.exp(z)

    l_scr[...] = l_scr[...] * jnp.exp(m_prev - m_new) + p_sum
    m_scr[...] = m_new

    @pl.when(c == n_c - 1)
    def _finalize():
        # Single 128 -> 1 cross-lane (XLU) combine per batch tile:
        #   logsumexp = M + log( sum_l l_l * exp(m_l - M) ),  M = max_l m_l
        m_lane = m_scr[...]
        m_row = jnp.max(m_lane, axis=-1, keepdims=True)
        l_row = jnp.sum(l_scr[...] * jnp.exp(m_lane - m_row),
                        axis=-1, keepdims=True)
        t_row = jnp.sum(t_scr[...], axis=-1, keepdims=True)
        # per-example cross-entropy = logsumexp(logits) - logits[y]
        out_ref[...] = m_row + jnp.log(l_row) - t_row


def _vmem_capacity_bytes():
    try:
        return int(pltpu.get_tpu_info().vmem_capacity_bytes)
    except Exception:
        return 64 << 20          # conservative (v7x-sized) fallback


def _is_multi_tensorcore_chip():
    # crude v7x detection (2 TensorCores per chip); single-TC chips return False
    try:
        kind = jax.devices()[0].device_kind.lower()
    except Exception:
        return False
    return ("v7" in kind) or ("7x" in kind)


def _vmem_estimate(b_tile, c_tile, d_pad, x_bytes, w_bytes, mxu_bytes):
    return (2 * b_tile * d_pad * x_bytes          # resident x block (dbl-buffered)
            + 3 * d_pad * c_tile * w_bytes        # streamed w (up to 3 buffers)
            + b_tile * d_pad * mxu_bytes          # s * normalized-x scratch
            + 3 * b_tile * 128 * 4                # per-lane m / l / t scratch
            + 4 * b_tile * 128 * 4                # y / out blocks (lane-padded)
            + 6 * b_tile * c_tile * 4)            # (b_tile, c_tile) f32 temps


def cosface_loss(x, w, y, *, s=64.0, m=0.35,
                 b_tile=256, c_tile=512,
                 mxu_dtype=jnp.bfloat16, exp_in_bf16=False):
    """x: (B, D) float, w: (C, D) float, y: (B,) int -> scalar f32 loss."""
    B, D = x.shape
    C, D2 = w.shape
    assert D == D2

    x_bytes = jnp.dtype(x.dtype).itemsize
    mxu_bytes = jnp.dtype(mxu_dtype).itemsize

    # Lane-dense / tile-aligned padding.
    D_pad = _round_up(D, 128)

    b_tile = max(8, _round_up(b_tile, 8))
    b_tile = min(b_tile, _round_up(B, 8))
    if _is_multi_tensorcore_chip() and B >= 256:
        # v7x: guarantee >= 2 batch tiles so the second TensorCore has work.
        # (Single-TC chips keep the larger tile and avoid re-reading w.)
        b_tile = min(b_tile, _round_up(pl.cdiv(B, 2), 8))

    c_tile = max(128, _round_up(c_tile, 128))
    c_tile = min(c_tile, _round_up(C, 128))

    # Generation-aware VMEM budget: physical capacity minus >=8 MiB (or 1/8)
    # headroom -> ~112 MiB on v5e/v6e (128 MiB), ~56 MiB on v7x (64 MiB).
    vmem_cap = _vmem_capacity_bytes()
    vmem_budget = vmem_cap - max(vmem_cap // 8, 8 << 20)
    while (_vmem_estimate(b_tile, c_tile, D_pad, x_bytes, mxu_bytes, mxu_bytes)
           > vmem_budget) and c_tile > 128:
        c_tile //= 2
    while (_vmem_estimate(b_tile, c_tile, D_pad, x_bytes, mxu_bytes, mxu_bytes)
           > vmem_budget) and b_tile > 8:
        b_tile = max(8, _round_up(b_tile // 2, 8))

    B_pad = _round_up(B, b_tile)
    C_pad = _round_up(C, c_tile)

    # One-shot w prep in the wrapper (amortized across batch tiles / steps):
    # F.normalize rows, pad, cast to bf16 and pre-transpose to (D_pad, C_pad)
    # so the kernel streams a native MXU (K, N) RHS at half the HBM bytes.
    w32 = w.astype(jnp.float32)
    w_inv = lax.rsqrt(jnp.maximum(
        jnp.sum(w32 * w32, axis=-1, keepdims=True), jnp.float32(1e-24)))
    w_n = (w32 * w_inv).astype(mxu_dtype)
    w_t = jnp.pad(w_n, ((0, C_pad - C), (0, D_pad - D))).T       # (D_pad, C_pad)

    x_p = jnp.pad(x, ((0, B_pad - B), (0, D_pad - D)))
    y_p = jnp.pad(y.astype(jnp.int32), (0, B_pad - B)).reshape(B_pad, 1)

    kernel = functools.partial(
        _cosface_kernel, s=float(s), m=float(m),
        num_classes=C, c_tile=c_tile, mxu_dtype=mxu_dtype,
        exp_in_bf16=bool(exp_in_bf16))

    vmem_est = _vmem_estimate(b_tile, c_tile, D_pad, x_bytes, mxu_bytes, mxu_bytes)
    vmem_limit = int(min(max(2 * vmem_est, 32 << 20), vmem_budget))

    grid = (B_pad // b_tile, C_pad // c_tile)

    def _call(extra_w_buffering):
        w_spec_kwargs = {}
        if extra_w_buffering:
            w_spec_kwargs = dict(pipeline_mode=pl.Buffered(3))
        return pl.pallas_call(
            kernel,
            out_shape=jax.ShapeDtypeStruct((B_pad, 1), jnp.float32),
            grid=grid,
            in_specs=[
                # x: resident per batch tile (constant over c)
                # TODO(synk): on v7x with very large D, read x via
                # memory_space=pl.ANY + one manual copy so this constant-in-c
                # block is not double-buffered.
                pl.BlockSpec((b_tile, D_pad), lambda b, c: (b, 0)),
                # w: pre-normalized bf16 (D_pad, c_tile) blocks streamed over c
                pl.BlockSpec((D_pad, c_tile), lambda b, c: (0, c),
                             **w_spec_kwargs),
                # y labels
                pl.BlockSpec((b_tile, 1), lambda b, c: (b, 0)),
            ],
            out_specs=pl.BlockSpec((b_tile, 1), lambda b, c: (b, 0)),
            scratch_shapes=[
                pltpu.VMEM((b_tile, D_pad), mxu_dtype),   # s * normalized x
                pltpu.VMEM((b_tile, 128), jnp.float32),   # per-lane running max
                pltpu.VMEM((b_tile, 128), jnp.float32),   # per-lane running sum
                pltpu.VMEM((b_tile, 128), jnp.float32),   # per-lane target logit
            ],
            compiler_params=pltpu.CompilerParams(
                dimension_semantics=("parallel", "arbitrary"),
                vmem_limit_bytes=vmem_limit),
        )(x_p, w_t, y_p)

    try:
        out = _call(True)
    except Exception:
        # pl.Buffered / pipeline_mode unsupported on this jax version: fall back
        # to the default double-buffered w stream.
        out = _call(False)

    return jnp.mean(out[:B, 0])


if __name__ == "__main__":
    # Small deterministic setup consistent with CosFace(feat_dim, subj_num).
    # Shapes deliberately non-multiples of 128 to exercise padding/masking.
    batch, feat_dim, subj_num = 8, 96, 200
    s_scale, margin = 64.0, 0.35

    key = jax.random.PRNGKey(0)
    kx, kw, ky = jax.random.split(key, 3)
    x = jax.random.normal(kx, (batch, feat_dim), dtype=jnp.float32)
    # xavier_normal_ init: std = sqrt(2 / (fan_in + fan_out))
    xavier_std = (2.0 / (subj_num + feat_dim)) ** 0.5
    w = xavier_std * jax.random.normal(kw, (subj_num, feat_dim), dtype=jnp.float32)
    y = jax.random.randint(ky, (batch,), 0, subj_num, dtype=jnp.int32)

    # Pure-JAX reference (mirrors the bf16 MXU inputs / f32 accumulation).
    x_n = x / jnp.maximum(jnp.linalg.norm(x, axis=-1, keepdims=True), 1e-12)
    w_n = w / jnp.maximum(jnp.linalg.norm(w, axis=-1, keepdims=True), 1e-12)
    cos = jnp.dot(x_n.astype(jnp.bfloat16), w_n.astype(jnp.bfloat16).T,
                  preferred_element_type=jnp.float32)
    oh = jax.nn.one_hot(y, subj_num, dtype=jnp.float32)
    logits = s_scale * (cos - margin * oh)
    ref = jnp.mean(jax.nn.logsumexp(logits, axis=-1)
                   - jnp.sum(logits * oh, axis=-1))

    # Default tiles: one C tile (c_tile=256) with 2 lane-groups + padded columns.
    loss_a = cosface_loss(x, w, y, s=s_scale, m=margin)
    # Small tiles: multiple C tiles exercise the online per-lane logsumexp carry.
    loss_b = cosface_loss(x, w, y, s=s_scale, m=margin, b_tile=8, c_tile=128)
    jax.block_until_ready((loss_a, loss_b))

    assert jnp.allclose(loss_a, ref, atol=2e-2, rtol=1e-3), (loss_a, ref)
    assert jnp.allclose(loss_b, ref, atol=2e-2, rtol=1e-3), (loss_b, ref)

    print("KERNEL_OK")
</pallas_src>

<mosaic_0001>
module attributes {stable_mosaic.version = 11 : i64} {
  func.func @_cosface_kernel(%arg0: i32, %arg1: i32, %arg2: memref<8x128xf32, #tpu.memory_space<vmem>>, %arg3: memref<128x256xbf16, #tpu.memory_space<vmem>>, %arg4: memref<8x1xi32, #tpu.memory_space<vmem>>, %arg5: memref<8x1xf32, #tpu.memory_space<vmem>>, %arg6: memref<8x128xbf16, #tpu.memory_space<vmem>>, %arg7: memref<8x128xf32, #tpu.memory_space<vmem>>, %arg8: memref<8x128xf32, #tpu.memory_space<vmem>>, %arg9: memref<8x128xf32, #tpu.memory_space<vmem>>) attributes {dimension_semantics = [#tpu.dimension_semantics<parallel>, #tpu.dimension_semantics<arbitrary>], iteration_bounds = array<i64: 1, 1>, scalar_prefetch = 0 : i64, scratch_operands = 4 : i64, tpu.core_type = #tpu.core_type<tc>, window_params = [{transform_indices = @transform_0, window_bounds = array<i64: 8, 128>}, {transform_indices = @transform_1, window_bounds = array<i64: 128, 256>}, {transform_indices = @transform_2, window_bounds = array<i64: 8, 1>}, {transform_indices = @transform_3, window_bounds = array<i64: 8, 1>}]} {
    %c0_i32 = arith.constant 0 : i32
    %0 = arith.cmpi eq, %arg1, %c0_i32 : i32
    %1 = arith.extui %0 : i1 to i32
    %c0_i32_0 = arith.constant 0 : i32
    %2 = arith.cmpi ne, %1, %c0_i32_0 : i32
    scf.if %2 {
      %c0_30 = arith.constant 0 : index
      %c0_31 = arith.constant 0 : index
      %65 = vector.load %arg2[%c0_30, %c0_31] : memref<8x128xf32, #tpu.memory_space<vmem>>, vector<8x128xf32>
      %66 = arith.mulf %65, %65 : vector<8x128xf32>
      %cst_32 = arith.constant dense<0.000000e+00> : vector<8xf32>
      %67 = vector.multi_reduction <add>, %66, %cst_32 [1] : vector<8x128xf32> to vector<8xf32>
      %68 = vector.shape_cast %67 : vector<8xf32> to vector<8x1xf32>
      %cst_33 = arith.constant 1.000000e-24 : f32
      %69 = vector.broadcast %cst_33 : f32 to vector<8x1xf32>
      %70 = arith.maximumf %68, %69 : vector<8x1xf32>
      %71 = math.rsqrt %70 : vector<8x1xf32>
      %cst_34 = arith.constant 6.400000e+01 : f32
      %72 = vector.broadcast %cst_34 : f32 to vector<8x1xf32>
      %73 = arith.mulf %71, %72 : vector<8x1xf32>
      %74 = vector.broadcast %73 : vector<8x1xf32> to vector<8x128xf32>
      %75 = arith.mulf %65, %74 : vector<8x128xf32>
      %76 = arith.truncf %75 : vector<8x128xf32> to vector<8x128xbf16>
      %c0_35 = arith.constant 0 : index
      %c0_36 = arith.constant 0 : index
      %77 = vector.load %arg6[%c0_35, %c0_36] : memref<8x128xbf16, #tpu.memory_space<vmem>>, vector<8x128xbf16>
      tpu.vector_store %arg6[%c0_35, %c0_36], %76 {strides = array<i32>} : memref<8x128xbf16, #tpu.memory_space<vmem>>, vector<8x128xbf16>,
      %cst_37 = arith.constant 0xFF800000 : f32
      %78 = vector.broadcast %cst_37 : f32 to vector<8x128xf32>
      %c0_38 = arith.constant 0 : index
      %c0_39 = arith.constant 0 : index
      %79 = vector.load %arg7[%c0_38, %c0_39] : memref<8x128xf32, #tpu.memory_space<vmem>>, vector<8x128xf32>
      tpu.vector_store %arg7[%c0_38, %c0_39], %78 {strides = array<i32>} : memref<8x128xf32, #tpu.memory_space<vmem>>, vector<8x128xf32>,
      %cst_40 = arith.constant 0.000000e+00 : f32
      %80 = vector.broadcast %cst_40 : f32 to vector<8x128xf32>
      %c0_41 = arith.constant 0 : index
      %c0_42 = arith.constant 0 : index
      %81 = vector.load %arg8[%c0_41, %c0_42] : memref<8x128xf32, #tpu.memory_space<vmem>>, vector<8x128xf32>
      tpu.vector_store %arg8[%c0_41, %c0_42], %80 {strides = array<i32>} : memref<8x128xf32, #tpu.memory_space<vmem>>, vector<8x128xf32>,
      %cst_43 = arith.constant 0.000000e+00 : f32
      %82 = vector.broadcast %cst_43 : f32 to vector<8x128xf32>
      %c0_44 = arith.constant 0 : index
      %c0_45 = arith.constant 0 : index
      %83 = vector.load %arg9[%c0_44, %c0_45] : memref<8x128xf32, #tpu.memory_space<vmem>>, vector<8x128xf32>
      tpu.vector_store %arg9[%c0_44, %c0_45], %82 {strides = array<i32>} : memref<8x128xf32, #tpu.memory_space<vmem>>, vector<8x128xf32>,
    } else {
    }
    %c0 = arith.constant 0 : index
    %c0_1 = arith.constant 0 : index
    %3 = vector.load %arg6[%c0, %c0_1] : memref<8x128xbf16, #tpu.memory_space<vmem>>, vector<8x128xbf16>
    %c0_2 = arith.constant 0 : index
    %c0_3 = arith.constant 0 : index
    %4 = vector.load %arg3[%c0_2, %c0_3] : memref<128x256xbf16, #tpu.memory_space<vmem>>, vector<128x256xbf16>
    %cst = arith.constant dense<0.000000e+00> : vector<8x256xf32>
    %5 = tpu.matmul %3, %4, %cst {dimension_numbers = #tpu.dot_dimension_numbers<[1], [0], [0], [1], [0, 0, 1, 1], [], []>} : vector<8x128xbf16>, vector<128x256xbf16>, vector<8x256xf32> -> vector<8x256xf32>
    %c0_4 = arith.constant 0 : index
    %c0_5 = arith.constant 0 : index
    %6 = vector.load %arg4[%c0_4, %c0_5] : memref<8x1xi32, #tpu.memory_space<vmem>>, vector<8x1xi32>
    %7 = tpu.iota {dimensions = array<i32: 1>} : vector<8x128xi32>
    %c256_i32 = arith.constant 256 : i32
    %8 = arith.muli %arg1, %c256_i32 : i32
    %cst_6 = arith.constant 0.000000e+00 : f32
    %9 = vector.broadcast %cst_6 : f32 to vector<8x128xf32>
    %10 = vector.extract_strided_slice %5 {offsets = [0, 0], sizes = [8, 128], strides = [1, 1]} : vector<8x256xf32> to vector<8x128xf32>
    %c0_i32_7 = arith.constant 0 : i32
    %11 = arith.addi %8, %c0_i32_7 : i32
    %12 = vector.broadcast %11 : i32 to vector<8x128xi32>
    %13 = arith.addi %12, %7 : vector<8x128xi32>
    %14 = vector.broadcast %6 : vector<8x1xi32> to vector<8x128xi32>
    %15 = arith.cmpi eq, %13, %14 : vector<8x128xi32>
    %cst_8 = arith.constant 2.240000e+01 : f32
    %16 = vector.broadcast %cst_8 : f32 to vector<8x128xf32>
    %17 = arith.subf %10, %16 : vector<8x128xf32>
    %18 = arith.select %15, %17, %10 : vector<8x128xi1>, vector<8x128xf32>
    %c200_i32 = arith.constant 200 : i32
    %19 = vector.broadcast %c200_i32 : i32 to vector<8x128xi32>
    %20 = arith.cmpi slt, %13, %19 : vector<8x128xi32>
    %cst_9 = arith.constant -1.000000e+30 : f32
    %21 = vector.broadcast %cst_9 : f32 to vector<8x128xf32>
    %22 = arith.select %20, %18, %21 : vector<8x128xi1>, vector<8x128xf32>
    %cst_10 = arith.constant 0.000000e+00 : f32
    %23 = vector.broadcast %cst_10 : f32 to vector<8x128xf32>
    %24 = arith.select %15, %22, %23 : vector<8x128xi1>, vector<8x128xf32>
    %25 = arith.addf %9, %24 : vector<8x128xf32>
    %26 = vector.extract_strided_slice %5 {offsets = [0, 128], sizes = [8, 128], strides = [1, 1]} : vector<8x256xf32> to vector<8x128xf32>
    %c128_i32 = arith.constant 128 : i32
    %27 = arith.addi %8, %c128_i32 : i32
    %28 = vector.broadcast %27 : i32 to vector<8x128xi32>
    %29 = arith.addi %28, %7 : vector<8x128xi32>
    %30 = vector.broadcast %6 : vector<8x1xi32> to vector<8x128xi32>
    %31 = arith.cmpi eq, %29, %30 : vector<8x128xi32>
    %cst_11 = arith.constant 2.240000e+01 : f32
    %32 = vector.broadcast %cst_11 : f32 to vector<8x128xf32>
    %33 = arith.subf %26, %32 : vector<8x128xf32>
    %34 = arith.select %31, %33, %26 : vector<8x128xi1>, vector<8x128xf32>
    %c200_i32_12 = arith.constant 200 : i32
    %35 = vector.broadcast %c200_i32_12 : i32 to vector<8x128xi32>
    %36 = arith.cmpi slt, %29, %35 : vector<8x128xi32>
    %cst_13 = arith.constant -1.000000e+30 : f32
    %37 = vector.broadcast %cst_13 : f32 to vector<8x128xf32>
    %38 = arith.select %36, %34, %37 : vector<8x128xi1>, vector<8x128xf32>
    %cst_14 = arith.constant 0.000000e+00 : f32
    %39 = vector.broadcast %cst_14 : f32 to vector<8x128xf32>
    %40 = arith.select %31, %38, %39 : vector<8x128xi1>, vector<8x128xf32>
    %41 = arith.addf %25, %40 : vector<8x128xf32>
    %c0_15 = arith.constant 0 : index
    %c0_16 = arith.constant 0 : index
    %42 = vector.load %arg9[%c0_15, %c0_16] : memref<8x128xf32, #tpu.memory_space<vmem>>, vector<8x128xf32>
    %43 = arith.addf %42, %41 : vector<8x128xf32>
    %c0_17 = arith.constant 0 : index
    %c0_18 = arith.constant 0 : index
    %44 = vector.load %arg9[%c0_17, %c0_18] : memref<8x128xf32, #tpu.memory_space<vmem>>, vector<8x128xf32>
    tpu.vector_store %arg9[%c0_17, %c0_18], %43 {strides = array<i32>} : memref<8x128xf32, #tpu.memory_space<vmem>>, vector<8x128xf32>,
    %45 = arith.maximumf %22, %38 : vector<8x128xf32>
    %c0_19 = arith.constant 0 : index
    %c0_20 = arith.constant 0 : index
    %46 = vector.load %arg7[%c0_19, %c0_20] : memref<8x128xf32, #tpu.memory_space<vmem>>, vector<8x128xf32>
    %47 = arith.maximumf %46, %45 : vector<8x128xf32>
    %cst_21 = arith.constant 0.000000e+00 : f32
    %48 = vector.broadcast %cst_21 : f32 to vector<8x128xf32>
    %49 = arith.subf %22, %47 : vector<8x128xf32>
    %50 = math.exp %49 : vector<8x128xf32>
    %51 = arith.addf %48, %50 : vector<8x128xf32>
    %52 = arith.subf %38, %47 : vector<8x128xf32>
    %53 = math.exp %52 : vector<8x128xf32>
    %54 = arith.addf %51, %53 : vector<8x128xf32>
    %c0_22 = arith.constant 0 : index
    %c0_23 = arith.constant 0 : index
    %55 = vector.load %arg8[%c0_22, %c0_23] : memref<8x128xf32, #tpu.memory_space<vmem>>, vector<8x128xf32>
    %56 = arith.subf %46, %47 : vector<8x128xf32>
    %57 = math.exp %56 : vector<8x128xf32>
    %58 = arith.mulf %55, %57 : vector<8x128xf32>
    %59 = arith.addf %58, %54 : vector<8x128xf32>
    %c0_24 = arith.constant 0 : index
    %c0_25 = arith.constant 0 : index
    %60 = vector.load %arg8[%c0_24, %c0_25] : memref<8x128xf32, #tpu.memory_space<vmem>>, vector<8x128xf32>
    tpu.vector_store %arg8[%c0_24, %c0_25], %59 {strides = array<i32>} : memref<8x128xf32, #tpu.memory_space<vmem>>, vector<8x128xf32>,
    %c0_26 = arith.constant 0 : index
    %c0_27 = arith.constant 0 : index
    %61 = vector.load %arg7[%c0_26, %c0_27] : memref<8x128xf32, #tpu.memory_space<vmem>>, vector<8x128xf32>
    tpu.vector_store %arg7[%c0_26, %c0_27], %47 {strides = array<i32>} : memref<8x128xf32, #tpu.memory_space<vmem>>, vector<8x128xf32>,
    %c0_i32_28 = arith.constant 0 : i32
    %62 = arith.cmpi eq, %arg1, %c0_i32_28 : i32
    %63 = arith.extui %62 : i1 to i32
    %c0_i32_29 = arith.constant 0 : i32
    %64 = arith.cmpi ne, %63, %c0_i32_29 : i32
    scf.if %64 {
      %c0_30 = arith.constant 0 : index
      %c0_31 = arith.constant 0 : index
      %65 = vector.load %arg7[%c0_30, %c0_31] : memref<8x128xf32, #tpu.memory_space<vmem>>, vector<8x128xf32>
      %cst_32 = arith.constant dense<0xFF800000> : vector<8xf32>
      %66 = vector.multi_reduction <maximumf>, %65, %cst_32 [1] : vector<8x128xf32> to vector<8xf32>
      %67 = vector.shape_cast %66 : vector<8xf32> to vector<8x1xf32>
      %c0_33 = arith.constant 0 : index
      %c0_34 = arith.constant 0 : index
      %68 = vector.load %arg8[%c0_33, %c0_34] : memref<8x128xf32, #tpu.memory_space<vmem>>, vector<8x128xf32>
      %69 = vector.broadcast %67 : vector<8x1xf32> to vector<8x128xf32>
      %70 = arith.subf %65, %69 : vector<8x128xf32>
      %71 = math.exp %70 : vector<8x128xf32>
      %72 = arith.mulf %68, %71 : vector<8x128xf32>
      %cst_35 = arith.constant dense<0.000000e+00> : vector<8xf32>
      %73 = vector.multi_reduction <add>, %72, %cst_35 [1] : vector<8x128xf32> to vector<8xf32>
      %74 = vector.shape_cast %73 : vector<8xf32> to vector<8x1xf32>
      %c0_36 = arith.constant 0 : index
      %c0_37 = arith.constant 0 : index
      %75 = vector.load %arg9[%c0_36, %c0_37] : memref<8x128xf32, #tpu.memory_space<vmem>>, vector<8x128xf32>
      %cst_38 = arith.constant dense<0.000000e+00> : vector<8xf32>
      %76 = vector.multi_reduction <add>, %75, %cst_38 [1] : vector<8x128xf32> to vector<8xf32>
      %77 = vector.shape_cast %76 : vector<8xf32> to vector<8x1xf32>
      %78 = math.log %74 : vector<8x1xf32>
      %79 = arith.addf %67, %78 : vector<8x1xf32>
      %80 = arith.subf %79, %77 : vector<8x1xf32>
      %c0_39 = arith.constant 0 : index
      %c0_40 = arith.constant 0 : index
      %81 = vector.load %arg5[%c0_39, %c0_40] : memref<8x1xf32, #tpu.memory_space<vmem>>, vector<8x1xf32>
      tpu.vector_store %arg5[%c0_39, %c0_40], %80 {strides = array<i32>} : memref<8x1xf32, #tpu.memory_space<vmem>>, vector<8x1xf32>,
    } else {
    }
    return
  }
  func.func @transform_0(%arg0: i32, %arg1: i32) -> (i32, i32) {
    %c0_i32 = arith.constant 0 : i32
    %c0_i32_0 = arith.constant 0 : i32
    return %arg0, %c0_i32 : i32, i32
  }
  func.func @transform_1(%arg0: i32, %arg1: i32) -> (i32, i32) {
    %c0_i32 = arith.constant 0 : i32
    %c0_i32_0 = arith.constant 0 : i32
    return %c0_i32, %arg1 : i32, i32
  }
  func.func @transform_2(%arg0: i32, %arg1: i32) -> (i32, i32) {
    %c0_i32 = arith.constant 0 : i32
    %c0_i32_0 = arith.constant 0 : i32
    return %arg0, %c0_i32 : i32, i32
  }
  func.func @transform_3(%arg0: i32, %arg1: i32) -> (i32, i32) {
    %c0_i32 = arith.constant 0 : i32
    %c0_i32_0 = arith.constant 0 : i32
    return %arg0, %c0_i32 : i32, i32
  }
}

</mosaic_0001>

<bundles_post_ra>
// kernel: tpu_custom_call.1
= control target key start
LH: loop header
LB: loop body
LE: loop exit
PB: predicated region body
PF: predicated region fallthrough
CT: control target
= control target key end

     0   :  { %8 = vsyncpa [#allocation7], 0  ;;  %s342_s12 = smov [#allocation6]   ;;  %s387_s0 = inlined_call_operand.vmem [shape: f32[8,128], index: 0, kind: input, shape index: {}]   ;;  %s388_s1 = inlined_call_operand.hbm [shape: bf16[128,256], index: 1, kind: input, shape index: {}]   ;;  %s389_s2 = inlined_call_operand.vmem [shape: s32[8,1], index: 2, kind: input, shape index: {}]   ;;  %s390_s3 = inlined_call_operand.vmem [shape: f32[8,1], index: 3, kind: output, shape index: {}]  }
   0x1   :  { %s16_s13 = sshll.u32 %s342_s12, 4  ;;  %s318_s16 = scalar_lea.hbm %s388_s1, 2048  ;;  %s17_s13 = int_to_ptr.vmem [resolvable:$true] %s16_s13 }
   0x2   :  { %p319_p0 = scmp.ne.s32.totalorder %s388_s1, %s318_s16  ;;  %p322_p1 = scmp.lt.u32.totalorder %s318_s16, %s388_s1 }
   0x4   :  { %p324_p2 = pnand %p322_p1, %p319_p0 }
   0x6   :  { %327 = shalt.err (!%p324_p2)
}
   0x7   :  { %s328_s21 = scalar_lea.vmem %s17_s13, 2048  ;;  %p333_p4 = scmp.lt.s32.totalorder %s17_s13, %s17_s13 }
   0x8   :  { %p329_p3 = scmp.ne.s32.totalorder %s17_s13, %s328_s21  ;;  %p334_p5 = scmp.lt.s32.totalorder %s328_s21, %s328_s21 }
   0xa   :  { %p335_p6 = por %p334_p5, %p333_p4 }
   0xc   :  { %p336_p7 = pnand %p335_p6, %p329_p3 }
   0xe   :  { %339 = shalt.err (!%p336_p7)
}
   0xf   :  { %s343_s22 = smov 128   ;;  %s344_s23 = smov 8  }
  0x10   :  { %22 = dma.hbm_to_vmem [thread:$0]  %s388_s1, 2048, %s17_s13, [#allocation7], %s343_s22, %s343_s22, %s344_s23  }
  0x11   :  { %340 = dma.done.wait [#allocation7], 2048  }
  0x12   :  { %341 = vsyncadd [#allocation7], 4294965248  ;;  %v33_v0 = vld [vmem:[%s387_s0] sm:$0xff]  ;;  %v282_v2 = vld [vmem:[#allocation6 + $0x4] ss:$8 sps:$4 sm:$0xff]   ;;  %v345_v18 = vmov 0   ;;  %v185_v27 = vlaneseq }
  0x13   :  { %v34_v1 = vmul.f32 %v33_v0, %v33_v0  ;;  %v284_v3 = vld [vmem:[#allocation6] ss:$8 sps:$4 sm:$0xff]   ;;  %v285_v4 = vld [vmem:[#allocation6 + $0x14] ss:$8 sps:$4 sm:$0xff]   ;;  %143 = vmatprep.subr.bf16.mxu0 %v282_v2  ;;  %v287_v5 = vld [vmem:[#allocation6 + $0x10] ss:$8 sps:$4 sm:$0xff]   ;;  %175 = vmatprep.mubr.bf16.mxu0 %v345_v18 }
  0x14   :  { %144 = vmatpush1.bf16.msra.mxu0 %v284_v3  ;;  %v288_v6 = vld [vmem:[#allocation6 + $0x24] ss:$8 sps:$4 sm:$0xff]   ;;  %v290_v7 = vld [vmem:[#allocation6 + $0x20] ss:$8 sps:$4 sm:$0xff]   ;;  %v291_v8 = vld [vmem:[#allocation6 + $0x34] ss:$8 sps:$4 sm:$0xff]   ;;  %281 = vset.pattern.permute.xlu0 %v345_v18 }
  0x15   :  { %35 = vadd.xlane.f32.xlu0 %v34_v1  ;;  %145 = vmatprep.subr.bf16.mxu0 %v285_v4  ;;  %v293_v9 = vld [vmem:[#allocation6 + $0x30] ss:$8 sps:$4 sm:$0xff]   ;;  %v294_v10 = vld [vmem:[#allocation6 + $0x44] ss:$8 sps:$4 sm:$0xff]   ;;  %v296_v11 = vld [vmem:[#allocation6 + $0x40] ss:$8 sps:$4 sm:$0xff]  }
  0x16   :  { %v297_v12 = vld [vmem:[#allocation6 + $0x54] ss:$8 sps:$4 sm:$0xff]   ;;  %v299_v13 = vld [vmem:[#allocation6 + $0x50] ss:$8 sps:$4 sm:$0xff]   ;;  %v300_v14 = vld [vmem:[#allocation6 + $0x64] ss:$8 sps:$4 sm:$0xff]  }
  0x17   :  { %v302_v15 = vld [vmem:[#allocation6 + $0x60] ss:$8 sps:$4 sm:$0xff]   ;;  %v303_v16 = vld [vmem:[#allocation6 + $0x74] ss:$8 sps:$4 sm:$0xff]   ;;  %v305_v17 = vld [vmem:[#allocation6 + $0x70] ss:$8 sps:$4 sm:$0xff]  }
  0x18   :  { %146 = vmatpush1.bf16.msra.mxu0 %v287_v5  ;;  %v184_v19 = vld [vmem:[%s389_s2] sm:$0xff]  ;;  %v186_v28 = vand.u32 127, %v185_v27  ;;  %vm252_vm3 = vcmask 7168  }
  0x19   :  { %147 = vmatprep.subr.bf16.mxu0 %v288_v6 }
  0x1a   :  { %v202_v29 = vadd.s32 128, %v186_v28 }
  0x1c   :  { %148 = vmatpush1.bf16.msra.mxu0 %v290_v7  ;;  %vm206_vm2 = vcmp.lt.s32.totalorder %v202_v29, 200 }
  0x1d   :  { %149 = vmatprep.subr.bf16.mxu0 %v291_v8 }
  0x20   :  { %150 = vmatpush1.bf16.msra.mxu0 %v293_v9 }
  0x21   :  { %151 = vmatprep.subr.bf16.mxu0 %v294_v10 }
  0x24   :  { %152 = vmatpush1.bf16.msra.mxu0 %v296_v11 }
  0x25   :  { %153 = vmatprep.subr.bf16.mxu0 %v297_v12 }
  0x28   :  { %154 = vmatpush1.bf16.msra.mxu0 %v299_v13 }
  0x29   :  { %155 = vmatprep.subr.bf16.mxu0 %v300_v14 }
  0x2b   :  { %191 = vperm.xlu0 %281, %v184_v19  }
  0x2c   :  { %156 = vmatpush1.bf16.msra.mxu0 %v302_v15 }
  0x2d   :  { %157 = vmatprep.subr.bf16.mxu0 %v303_v16 }
  0x30   :  { %158 = vmatpush1.bf16.msra.mxu0 %v305_v17 }
  0xa2   :  { %v36_v20 = vpop.xlane.xlu0 %35 }
  0xa3   :  { %v37_v21 = vmax.f32 %v36_v20, 1e-24 }
  0xa5   :  { %306 = vrsqrt.f32 %v37_v21 }
  0xaa   :  { %v192_v30 = vpop.permute.xlu0 %191 }
  0xab   :  { %vm193_vm0 = vcmp.eq.s32.totalorder %v186_v28, %v192_v30  ;;  %vm203_vm1 = vcmp.eq.s32.totalorder %v202_v29, %v192_v30 }
  0xaf   :  { %v307_v22 = vpop.eup %306 }
  0xb0   :  { %v39_v23 = vmul.f32 64.0, %v307_v22 }
  0xb2   :  { %v40_v24 = vmul.f32 %v39_v23, %v33_v0 }
  0xb4   :  { %v41_v25 = vpack.c.bf16 %v40_v24, %v40_v24 }
  0xb6   :  { %42 = vst [vmem:[#allocation2] sm:$0xf] %v41_v25 }
  0xbd   :  { %v46_v26 = vld [vmem:[#allocation2] sm:$0xf] }
  0xbe   :  { %176 = vmatmul.mubr.bf16.vlgmr.msra.gmra.mrb[0].mxu0 %v46_v26 }
 0x191   :  { %v177_v31 = vpop.f32.mrb[0].mxu0 }
 0x192   :  { %v275_v32 = vadd.f32 -22.4, %v177_v31  ;;  %v179_v33 = vpop.f32.mrb[1].mxu0 }
 0x193   :  { %v276_v34 = vadd.f32 -22.4, %v179_v33  ;;  %v181_v35 = vpop.f32.mrb[2].mxu0 }
 0x194   :  { %v195_v36 = vsel %vm193_vm0, %v275_v32, %v177_v31  ;;  %v182_v37 = vpop.f32.mrb[3].mxu0 }
 0x195   :  { %v198_v38 = vsel %vm193_vm0, %v195_v36, 0.0  ;;  %v205_v39 = vsel %vm203_vm1, %v276_v34, %v179_v33 }
 0x196   :  { %v207_v40 = vsel %vm206_vm2, %v205_v39, -1e+30 }
 0x197   :  { %v208_v41 = vsel %vm203_vm1, %v207_v40, 0.0  ;;  %v213_v42 = vmax.f32 %v195_v36, %v207_v40 }
 0x198   :  { %v209_v43 = vadd.f32 %v208_v41, %v198_v38 }
 0x199   :  { %v216_v44 = vsub.f32 %v195_v36, %v213_v42  ;;  %v220_v45 = vsub.f32 %v207_v40, %v213_v42  ;;  %236 = vmax.xlane.f32.xlu1 %v213_v42  ;;  %v225_v51 = vsub.f32 -inf, %v213_v42 }
 0x19b   :  { %v217_v46 = vmul.f32 1.442695, %v216_v44  ;;  %v221_v47 = vmul.f32 1.442695, %v220_v45  ;;  %v226_v52 = vmul.f32 1.442695, %v225_v51 }
 0x19d   :  { %308 = vpow2.f32 %v217_v46 }
 0x19e   :  { %310 = vpow2.f32 %v221_v47 }
 0x19f   :  { %312 = vpow2.f32 %v226_v52 }
 0x1a7   :  { %v309_v48 = vpop.eup %308 }
 0x1a8   :  { %v311_v49 = vpop.eup %310 }
 0x1a9   :  { %v223_v50 = vadd.f32 %v311_v49, %v309_v48  ;;  %v313_v56 = vpop.eup %312 }
 0x1aa   :  { %v228_v57 = vmul.f32 0.0, %v313_v56 }
 0x1ac   :  { %v229_v58 = vadd.f32 %v228_v57, %v223_v50 }
 0x226   :  { %v237_v53 = vpop.xlane.xlu1 %236 }
 0x227   :  { %v239_v54 = vsub.f32 %v213_v42, %v237_v53 }
 0x229   :  { %v240_v55 = vmul.f32 1.442695, %v239_v54 }
 0x22b   :  { %314 = vpow2.f32 %v240_v55 }
 0x235   :  { %v315_v59 = vpop.eup %314 }
 0x236   :  { %v242_v60 = vmul.f32 %v315_v59, %v229_v58 }
 0x238   :  { %243 = vadd.xlane.f32.xlu1 %v242_v60 }
 0x23c   :  { %246 = vadd.xlane.f32.xlu1 %v209_v43 }
 0x2c5   :  { %v244_v61 = vpop.xlane.xlu1 %243 }
 0x2c6   :  { %316 = vlog2.f32 %v244_v61 }
 0x2c9   :  { %v247_v1 = vpop.xlane.xlu1 %246 }
 0x2d0   :  { %v317_v62 = vpop.eup %316 }
 0x2d1   :  { %v249_v63 = vmul.f32 0.6931472, %v317_v62 }
 0x2d3   :  { %v250_v0 = vadd.f32 %v249_v63, %v237_v53 }
 0x2d5   :  { %v251_v2 = vsub.f32 %v250_v0, %v247_v1 }
 0x2d7   :  { %253 = vst.msk [vmem:[%s390_s3] sm:$0xff] %vm252_vm3, %v251_v2 }
 0x2d8   :  { %258 = vsyncpa [#allocation7], 1 }

</bundles_post_ra>
